<compile_context>
chip_gen: v7x
topology: tpu7x:2x2x1
jax: 0.10.0
libtpu: 0.0.40
codegen_flags: <defaults>
</compile_context>

<pallas_src>
import functools

import jax
import jax.numpy as jnp
from jax.experimental import pallas as pl
from jax.experimental.pallas import tpu as pltpu


def _round_up(x, m):
    return ((x + m - 1) // m) * m


def _tile_dims(in_dim, out_dim):
    """(8,128)-aligned K/N tile sizes and padded extents (shape-only, static)."""
    TK = min(1024, _round_up(in_dim, 128))
    TN = min(1024, _round_up(out_dim, 128))
    K_p = _round_up(in_dim, TK)
    N_p = _round_up(out_dim, TN)
    return TK, TN, K_p, N_p


def prepare_params(weight, bias, compute_dtype=jnp.bfloat16):
    """One-time parameter preprocessing (do this at init, NOT per forward call).

    weight: (out_dim, in_dim) PyTorch nn.Linear layout; bias: (out_dim,).
    Returns (w_t, b2): w_t is (K_p, N_p) in compute_dtype (pre-padded,
    pre-transposed), b2 is (1, N_p) float32 (pre-padded).
    """
    out_dim, in_dim = weight.shape
    _, _, K_p, N_p = _tile_dims(in_dim, out_dim)

    w = weight
    if (N_p, K_p) != (out_dim, in_dim):
        # Zero padding is exact: padded K cols contribute 0 to the dot, padded
        # N rows give relu(0 + 0) = 0 in the row sum.
        w = jnp.pad(w, ((0, N_p - out_dim), (0, K_p - in_dim)))
    w_t = jnp.asarray(w.T, dtype=compute_dtype)          # (K_p, N_p), one-time

    b2 = bias.reshape(1, out_dim).astype(jnp.float32)
    if N_p != out_dim:
        b2 = jnp.pad(b2, ((0, 0), (0, N_p - out_dim)))
    return w_t, b2


def _rectifier_kernel(x_ref, w_ref, b_ref, o_ref, acc_ref, sum_ref):
    # Grid = (batch tiles [parallel], out_dim tiles [reduction], in_dim tiles
    # [reduction]); output block is resident across (n, k).
    n = pl.program_id(1)
    k = pl.program_id(2)
    nn = pl.num_programs(1)
    nk = pl.num_programs(2)

    # Zero the per-row running sum at the start of each batch tile's reduction.
    @pl.when((n == 0) & (k == 0))
    def _():
        sum_ref[...] = jnp.zeros_like(sum_ref)

    # (TB, TK) @ (TK, TN) on the MXU, f32 accumulation.
    partial = jnp.dot(x_ref[...], w_ref[...], preferred_element_type=jnp.float32)

    @pl.when(k == 0)
    def _():
        acc_ref[...] = partial          # first K step: write, don't zero+add

    @pl.when(k > 0)
    def _():
        acc_ref[...] += partial

    # K loop finished for this N tile: bias + relu + partial row-sum (runs once
    # per (b, n) tile, i.e. only after full K accumulation -> same math as torch).
    @pl.when(k == nk - 1)
    def _():
        h = acc_ref[...] + b_ref[...]
        h = jnp.maximum(h, 0.0)
        sum_ref[...] += jnp.sum(h, axis=1, keepdims=True)

    # Final epilogue: sigmoid(1 - s); broadcast across 128 lanes so the
    # writeback is an unmasked, lane-dense store.
    @pl.when((n == nn - 1) & (k == nk - 1))
    def _():
        out = jax.nn.sigmoid(1.0 - sum_ref[...])         # (TB, 1)
        o_ref[...] = jnp.broadcast_to(out, o_ref.shape).astype(o_ref.dtype)


@jax.jit
def rectifier_forward(x, w_t, b2):
    """x: (B, in_dim); w_t/b2: outputs of prepare_params. Returns (B,) float32."""
    B, in_dim = x.shape
    K_p, N_p = w_t.shape
    # Tile sizes divide the padded extents by construction (see _tile_dims).
    TK = min(1024, K_p)
    TN = min(1024, N_p)
    TB = min(512, _round_up(B, 8))
    B_p = _round_up(B, TB)

    # Only x is touched per call: cast to the weight's compute dtype and pad.
    x = x.astype(w_t.dtype)
    if (B_p, K_p) != (B, in_dim):
        x = jnp.pad(x, ((0, B_p - B), (0, K_p - in_dim)))

    grid = (B_p // TB, N_p // TN, K_p // TK)

    out = pl.pallas_call(
        _rectifier_kernel,
        out_shape=jax.ShapeDtypeStruct((B_p, 128), jnp.float32),
        grid_spec=pltpu.PrefetchScalarGridSpec(
            num_scalar_prefetch=0,
            grid=grid,
            in_specs=[
                pl.BlockSpec((TB, TK), lambda b, n, k: (b, k)),   # x
                pl.BlockSpec((TK, TN), lambda b, n, k: (k, n)),   # weight^T
                pl.BlockSpec((1, TN), lambda b, n, k: (0, n)),    # bias (f32)
            ],
            out_specs=pl.BlockSpec((TB, 128), lambda b, n, k: (b, 0)),
            scratch_shapes=[
                pltpu.VMEM((TB, TN), jnp.float32),   # matmul accumulator
                pltpu.VMEM((TB, 1), jnp.float32),    # running row-sum
            ],
        ),
        compiler_params=pltpu.CompilerParams(
            dimension_semantics=("parallel", "arbitrary", "arbitrary"),
            vmem_limit_bytes=32 * 1024 * 1024,
        ),
    )(x, w_t, b2)

    return out[:B, 0]  # (B,) like the PyTorch output


def init_params(key, in_dim, out_dim):
    """Deterministic init mimicking nn.Linear default (uniform +/- 1/sqrt(in_dim))."""
    k_w, k_b = jax.random.split(key)
    bound = 1.0 / jnp.sqrt(jnp.float32(in_dim))
    weight = jax.random.uniform(
        k_w, (out_dim, in_dim), dtype=jnp.float32, minval=-bound, maxval=bound
    )
    bias = jax.random.uniform(
        k_b, (out_dim,), dtype=jnp.float32, minval=-bound, maxval=bound
    )
    return weight, bias


def _torch_ref(x, weight, bias):
    return jax.nn.sigmoid(
        1.0 - jnp.sum(jnp.maximum(x @ weight.T + bias, 0.0), axis=1)
    )


if __name__ == "__main__":
    key = jax.random.PRNGKey(0)
    k_x, k_p, k_x2, k_p2 = jax.random.split(key, 4)

    # --- Test 1: small shapes consistent with the module. ---
    B, in_dim, out_dim = 2, 16, 32
    x = jax.random.normal(k_x, (B, in_dim), dtype=jnp.float32)
    weight, bias = init_params(k_p, in_dim, out_dim)
    ref = _torch_ref(x, weight, bias)

    # f32 path (tight parity check with the PyTorch math).
    w_f32, b_pad = prepare_params(weight, bias, compute_dtype=jnp.float32)
    out_f32 = rectifier_forward(x, w_f32, b_pad)
    jax.block_until_ready(out_f32)
    assert out_f32.shape == (B,)
    assert jnp.allclose(out_f32, ref, atol=1e-5, rtol=1e-5)

    # Default bf16 compute path (f32 accumulation), looser tolerance.
    w_bf16, b_pad_bf = prepare_params(weight, bias)
    out_bf16 = rectifier_forward(x, w_bf16, b_pad_bf)
    jax.block_until_ready(out_bf16)
    assert jnp.allclose(out_bf16, ref, atol=2e-2)

    # --- Test 2: multi-tile grid (2 K tiles, 2 N tiles) + padding path. ---
    B2, in2, out2 = 16, 1536, 1280
    # Scale x down so the sigmoid isn't fully saturated (more meaningful check).
    x2 = 0.01 * jax.random.normal(k_x2, (B2, in2), dtype=jnp.float32)
    w2, bia2 = init_params(k_p2, in2, out2)
    ref2 = _torch_ref(x2, w2, bia2)

    w2_f32, b2_pad = prepare_params(w2, bia2, compute_dtype=jnp.float32)
    out2_f32 = rectifier_forward(x2, w2_f32, b2_pad)
    jax.block_until_ready(out2_f32)
    assert out2_f32.shape == (B2,)
    assert jnp.allclose(out2_f32, ref2, atol=1e-4, rtol=1e-4)

    w2_bf16, b2_pad_bf = prepare_params(w2, bia2)
    out2_bf16 = rectifier_forward(x2, w2_bf16, b2_pad_bf)
    jax.block_until_ready(out2_bf16)
    assert jnp.allclose(out2_bf16, ref2, atol=3e-2)

    print("KERNEL_OK")
</pallas_src>

<mosaic_0001>
module attributes {stable_mosaic.version = 11 : i64} {
  func.func @_rectifier_kernel(%arg0: i32, %arg1: i32, %arg2: i32, %arg3: memref<8x128xf32, #tpu.memory_space<vmem>>, %arg4: memref<128x128xf32, #tpu.memory_space<vmem>>, %arg5: memref<1x128xf32, #tpu.memory_space<vmem>>, %arg6: memref<8x128xf32, #tpu.memory_space<vmem>>, %arg7: memref<8x128xf32, #tpu.memory_space<vmem>>, %arg8: memref<8x1xf32, #tpu.memory_space<vmem>>) attributes {dimension_semantics = [#tpu.dimension_semantics<parallel>, #tpu.dimension_semantics<arbitrary>, #tpu.dimension_semantics<arbitrary>], iteration_bounds = array<i64: 1, 1, 1>, scalar_prefetch = 0 : i64, scratch_operands = 2 : i64, tpu.core_type = #tpu.core_type<tc>, window_params = [{transform_indices = @transform_0, window_bounds = array<i64: 8, 128>}, {transform_indices = @transform_1, window_bounds = array<i64: 128, 128>}, {transform_indices = @transform_2, window_bounds = array<i64: 1, 128>}, {transform_indices = @transform_3, window_bounds = array<i64: 8, 128>}]} {
    %c0_i32 = arith.constant 0 : i32
    %0 = arith.cmpi eq, %arg1, %c0_i32 : i32
    %c0_i32_0 = arith.constant 0 : i32
    %1 = arith.cmpi eq, %arg2, %c0_i32_0 : i32
    %2 = arith.andi %0, %1 : i1
    %3 = arith.extui %2 : i1 to i32
    %c0_i32_1 = arith.constant 0 : i32
    %4 = arith.cmpi ne, %3, %c0_i32_1 : i32
    scf.if %4 {
      %cst_14 = arith.constant 0.000000e+00 : f32
      %22 = vector.broadcast %cst_14 : f32 to vector<8x1xf32>
      %c0_15 = arith.constant 0 : index
      %c0_16 = arith.constant 0 : index
      %23 = vector.load %arg8[%c0_15, %c0_16] : memref<8x1xf32, #tpu.memory_space<vmem>>, vector<8x1xf32>
      tpu.vector_store %arg8[%c0_15, %c0_16], %22 {strides = array<i32>} : memref<8x1xf32, #tpu.memory_space<vmem>>, vector<8x1xf32>,
    } else {
    }
    %c0 = arith.constant 0 : index
    %c0_2 = arith.constant 0 : index
    %5 = vector.load %arg3[%c0, %c0_2] : memref<8x128xf32, #tpu.memory_space<vmem>>, vector<8x128xf32>
    %c0_3 = arith.constant 0 : index
    %c0_4 = arith.constant 0 : index
    %6 = vector.load %arg4[%c0_3, %c0_4] : memref<128x128xf32, #tpu.memory_space<vmem>>, vector<128x128xf32>
    %cst = arith.constant dense<0.000000e+00> : vector<8x128xf32>
    %7 = tpu.matmul %5, %6, %cst {dimension_numbers = #tpu.dot_dimension_numbers<[1], [0], [0], [1], [0, 0, 1, 1], [], []>} : vector<8x128xf32>, vector<128x128xf32>, vector<8x128xf32> -> vector<8x128xf32>
    %c0_i32_5 = arith.constant 0 : i32
    %8 = arith.cmpi eq, %arg2, %c0_i32_5 : i32
    %9 = arith.extui %8 : i1 to i32
    %c0_i32_6 = arith.constant 0 : i32
    %10 = arith.cmpi ne, %9, %c0_i32_6 : i32
    scf.if %10 {
      %c0_14 = arith.constant 0 : index
      %c0_15 = arith.constant 0 : index
      %22 = vector.load %arg7[%c0_14, %c0_15] : memref<8x128xf32, #tpu.memory_space<vmem>>, vector<8x128xf32>
      tpu.vector_store %arg7[%c0_14, %c0_15], %7 {strides = array<i32>} : memref<8x128xf32, #tpu.memory_space<vmem>>, vector<8x128xf32>,
    } else {
    }
    %c0_i32_7 = arith.constant 0 : i32
    %11 = arith.cmpi sgt, %arg2, %c0_i32_7 : i32
    %12 = arith.extui %11 : i1 to i32
    %c0_i32_8 = arith.constant 0 : i32
    %13 = arith.cmpi ne, %12, %c0_i32_8 : i32
    scf.if %13 {
      %c0_14 = arith.constant 0 : index
      %c0_15 = arith.constant 0 : index
      %22 = vector.load %arg7[%c0_14, %c0_15] : memref<8x128xf32, #tpu.memory_space<vmem>>, vector<8x128xf32>
      %23 = arith.addf %22, %7 : vector<8x128xf32>
      %c0_16 = arith.constant 0 : index
      %c0_17 = arith.constant 0 : index
      %24 = vector.load %arg7[%c0_16, %c0_17] : memref<8x128xf32, #tpu.memory_space<vmem>>, vector<8x128xf32>
      tpu.vector_store %arg7[%c0_16, %c0_17], %23 {strides = array<i32>} : memref<8x128xf32, #tpu.memory_space<vmem>>, vector<8x128xf32>,
    } else {
    }
    %c0_i32_9 = arith.constant 0 : i32
    %14 = arith.cmpi eq, %arg2, %c0_i32_9 : i32
    %15 = arith.extui %14 : i1 to i32
    %c0_i32_10 = arith.constant 0 : i32
    %16 = arith.cmpi ne, %15, %c0_i32_10 : i32
    scf.if %16 {
      %c0_14 = arith.constant 0 : index
      %c0_15 = arith.constant 0 : index
      %22 = vector.load %arg7[%c0_14, %c0_15] : memref<8x128xf32, #tpu.memory_space<vmem>>, vector<8x128xf32>
      %c0_16 = arith.constant 0 : index
      %c0_17 = arith.constant 0 : index
      %23 = vector.load %arg5[%c0_16, %c0_17] : memref<1x128xf32, #tpu.memory_space<vmem>>, vector<1x128xf32>
      %24 = vector.broadcast %23 : vector<1x128xf32> to vector<8x128xf32>
      %25 = arith.addf %22, %24 : vector<8x128xf32>
      %cst_18 = arith.constant 0.000000e+00 : f32
      %26 = vector.broadcast %cst_18 : f32 to vector<8x128xf32>
      %27 = arith.maximumf %25, %26 : vector<8x128xf32>
      %c0_19 = arith.constant 0 : index
      %c0_20 = arith.constant 0 : index
      %28 = vector.load %arg8[%c0_19, %c0_20] : memref<8x1xf32, #tpu.memory_space<vmem>>, vector<8x1xf32>
      %cst_21 = arith.constant dense<0.000000e+00> : vector<8xf32>
      %29 = vector.multi_reduction <add>, %27, %cst_21 [1] : vector<8x128xf32> to vector<8xf32>
      %30 = vector.shape_cast %29 : vector<8xf32> to vector<8x1xf32>
      %31 = arith.addf %28, %30 : vector<8x1xf32>
      %c0_22 = arith.constant 0 : index
      %c0_23 = arith.constant 0 : index
      %32 = vector.load %arg8[%c0_22, %c0_23] : memref<8x1xf32, #tpu.memory_space<vmem>>, vector<8x1xf32>
      tpu.vector_store %arg8[%c0_22, %c0_23], %31 {strides = array<i32>} : memref<8x1xf32, #tpu.memory_space<vmem>>, vector<8x1xf32>,
    } else {
    }
    %c0_i32_11 = arith.constant 0 : i32
    %17 = arith.cmpi eq, %arg1, %c0_i32_11 : i32
    %c0_i32_12 = arith.constant 0 : i32
    %18 = arith.cmpi eq, %arg2, %c0_i32_12 : i32
    %19 = arith.andi %17, %18 : i1
    %20 = arith.extui %19 : i1 to i32
    %c0_i32_13 = arith.constant 0 : i32
    %21 = arith.cmpi ne, %20, %c0_i32_13 : i32
    scf.if %21 {
      %c0_14 = arith.constant 0 : index
      %c0_15 = arith.constant 0 : index
      %22 = vector.load %arg8[%c0_14, %c0_15] : memref<8x1xf32, #tpu.memory_space<vmem>>, vector<8x1xf32>
      %cst_16 = arith.constant 1.000000e+00 : f32
      %23 = vector.broadcast %cst_16 : f32 to vector<8x1xf32>
      %24 = arith.subf %23, %22 : vector<8x1xf32>
      %25 = arith.negf %24 : vector<8x1xf32>
      %26 = math.exp %25 : vector<8x1xf32>
      %cst_17 = arith.constant 1.000000e+00 : f32
      %27 = vector.broadcast %cst_17 : f32 to vector<8x1xf32>
      %28 = arith.addf %27, %26 : vector<8x1xf32>
      %29 = arith.divf %27, %28 : vector<8x1xf32>
      %30 = vector.shape_cast %29 : vector<8x1xf32> to vector<8x1xf32>
      %31 = vector.broadcast %30 : vector<8x1xf32> to vector<8x128xf32>
      %c0_18 = arith.constant 0 : index
      %c0_19 = arith.constant 0 : index
      %32 = vector.load %arg6[%c0_18, %c0_19] : memref<8x128xf32, #tpu.memory_space<vmem>>, vector<8x128xf32>
      tpu.vector_store %arg6[%c0_18, %c0_19], %31 {strides = array<i32>} : memref<8x128xf32, #tpu.memory_space<vmem>>, vector<8x128xf32>,
    } else {
    }
    return
  }
  func.func @transform_0(%arg0: i32, %arg1: i32, %arg2: i32) -> (i32, i32) {
    %c0_i32 = arith.constant 0 : i32
    return %arg0, %arg2 : i32, i32
  }
  func.func @transform_1(%arg0: i32, %arg1: i32, %arg2: i32) -> (i32, i32) {
    %c0_i32 = arith.constant 0 : i32
    return %arg2, %arg1 : i32, i32
  }
  func.func @transform_2(%arg0: i32, %arg1: i32, %arg2: i32) -> (i32, i32) {
    %c0_i32 = arith.constant 0 : i32
    %c0_i32_0 = arith.constant 0 : i32
    return %c0_i32, %arg1 : i32, i32
  }
  func.func @transform_3(%arg0: i32, %arg1: i32, %arg2: i32) -> (i32, i32) {
    %c0_i32 = arith.constant 0 : i32
    %c0_i32_0 = arith.constant 0 : i32
    return %arg0, %c0_i32 : i32, i32
  }
}

</mosaic_0001>

<bundles_post_ra>
// kernel: rectifier_forward.1
= control target key start
LH: loop header
LB: loop body
LE: loop exit
PB: predicated region body
PF: predicated region fallthrough
CT: control target
= control target key end

     0   :  { %8 = vsyncpa [#allocation5], 0  ;;  %s288_s12 = smov [#allocation4]   ;;  %s338_s0 = inlined_call_operand.vmem [shape: f32[8,128], index: 0, kind: input, shape index: {}]   ;;  %s339_s1 = inlined_call_operand.hbm [shape: f32[128,128], index: 1, kind: input, shape index: {}]   ;;  %s340_s2 = inlined_call_operand.vmem [shape: f32[1,128], index: 2, kind: input, shape index: {}]   ;;  %s341_s3 = inlined_call_operand.vmem [shape: f32[8,128], index: 3, kind: output, shape index: {}]  }
   0x1   :  { %s16_s13 = sshll.u32 %s288_s12, 4  ;;  %s264_s16 = scalar_lea.hbm %s339_s1, 2048  ;;  %s17_s13 = int_to_ptr.vmem [resolvable:$true] %s16_s13 }
   0x2   :  { %p265_p0 = scmp.ne.s32.totalorder %s339_s1, %s264_s16  ;;  %p268_p1 = scmp.lt.u32.totalorder %s264_s16, %s339_s1 }
   0x4   :  { %p270_p2 = pnand %p268_p1, %p265_p0 }
   0x6   :  { %273 = shalt.err (!%p270_p2)
}
   0x7   :  { %s274_s21 = scalar_lea.vmem %s17_s13, 2048  ;;  %p279_p4 = scmp.lt.s32.totalorder %s17_s13, %s17_s13 }
   0x8   :  { %p275_p3 = scmp.ne.s32.totalorder %s17_s13, %s274_s21  ;;  %p280_p5 = scmp.lt.s32.totalorder %s274_s21, %s274_s21 }
   0xa   :  { %p281_p6 = por %p280_p5, %p279_p4 }
   0xc   :  { %p282_p7 = pnand %p281_p6, %p275_p3 }
   0xe   :  { %285 = shalt.err (!%p282_p7)
}
   0xf   :  { %s289_s22 = smov 128   ;;  %s290_s23 = smov 8  }
  0x10   :  { %22 = dma.hbm_to_vmem [thread:$0]  %s339_s1, 2048, %s17_s13, [#allocation5], %s289_s22, %s289_s22, %s290_s23  }
  0x11   :  { %286 = dma.done.wait [#allocation5], 2048  }
  0x12   :  { %287 = vsyncadd [#allocation5], 4294965248  ;;  %vm34_vm0 = vcmask 7168   ;;  %v291_v0 = vmov 0.0|0.0   ;;  %v292_v1 = vmov 0.0   ;;  %vm293_vm1 = vmmov 0  }
  0x13   :  { %228 = vmatprep.subr.bf16.mxu0 %v291_v0  ;;  %35 = vst.msk [vmem:[#allocation3] sm:$0xff] %vm34_vm0, %v292_v1  ;;  %225 = vmatprep.mubr.msk.f32.mxu0 %vm293_vm1, %v292_v1  ;;  %v37_v2 = vld [vmem:[#allocation4] sm:$0xff]  ;;  %v38_v3 = vld [vmem:[#allocation4 + $0x8] sm:$0xff]  ;;  %v39_v4 = vld [vmem:[#allocation4 + $0x10] sm:$0xff]  ;;  %v294_v32 = vmov 0  }
  0x14   :  { %v229_v5 = vpack.c.bf16 %v38_v3, %v37_v2  ;;  %v40_v6 = vld [vmem:[#allocation4 + $0x18] sm:$0xff]  ;;  %v41_v8 = vld [vmem:[#allocation4 + $0x20] sm:$0xff]  ;;  %v42_v9 = vld [vmem:[#allocation4 + $0x28] sm:$0xff]  ;;  %259 = vset.pattern.permute.xlu0 %v294_v32 }
  0x15   :  { %v232_v7 = vpack.c.bf16 %v40_v6, %v39_v4  ;;  %v235_v10 = vpack.c.bf16 %v42_v9, %v41_v8  ;;  %v43_v11 = vld [vmem:[#allocation4 + $0x30] sm:$0xff]  ;;  %v44_v12 = vld [vmem:[#allocation4 + $0x38] sm:$0xff]  ;;  %v45_v14 = vld [vmem:[#allocation4 + $0x40] sm:$0xff] }
  0x16   :  { %230 = vmatpush3.bf16.msra.mxu0 %v229_v5  ;;  %v238_v13 = vpack.c.bf16 %v44_v12, %v43_v11  ;;  %v46_v15 = vld [vmem:[#allocation4 + $0x48] sm:$0xff]  ;;  %v47_v17 = vld [vmem:[#allocation4 + $0x50] sm:$0xff]  ;;  %v48_v18 = vld [vmem:[#allocation4 + $0x58] sm:$0xff] }
  0x17   :  { %231 = vmatprep.subr.bf16.mxu0 %v291_v0  ;;  %v241_v16 = vpack.c.bf16 %v46_v15, %v45_v14  ;;  %v244_v19 = vpack.c.bf16 %v48_v18, %v47_v17  ;;  %v49_v20 = vld [vmem:[#allocation4 + $0x60] sm:$0xff]  ;;  %v50_v21 = vld [vmem:[#allocation4 + $0x68] sm:$0xff]  ;;  %v51_v23 = vld [vmem:[#allocation4 + $0x70] sm:$0xff] }
  0x18   :  { %v247_v22 = vpack.c.bf16 %v50_v21, %v49_v20  ;;  %v52_v24 = vld [vmem:[#allocation4 + $0x78] sm:$0xff] }
  0x19   :  { %v250_v25 = vpack.c.bf16 %v52_v24, %v51_v23  ;;  %v36_v26 = vld [vmem:[%s338_s0] sm:$0xff] }
  0x1a   :  { %233 = vmatpush3.bf16.msra.mxu0 %v232_v7  ;;  %v174_v27 = vld [vmem:[%s340_s2] ss:$0 sm:$0xff] }
  0x1b   :  { %234 = vmatprep.subr.bf16.mxu0 %v291_v0  ;;  %v147_v33 = vld [vmem:[#allocation3] sm:$0xff] }
  0x1e   :  { %236 = vmatpush3.bf16.msra.mxu0 %v235_v10 }
  0x1f   :  { %237 = vmatprep.subr.bf16.mxu0 %v291_v0 }
  0x22   :  { %239 = vmatpush3.bf16.msra.mxu0 %v238_v13 }
  0x23   :  { %240 = vmatprep.subr.bf16.mxu0 %v291_v0 }
  0x26   :  { %242 = vmatpush3.bf16.msra.mxu0 %v241_v16 }
  0x27   :  { %243 = vmatprep.subr.bf16.mxu0 %v291_v0 }
  0x2a   :  { %245 = vmatpush3.bf16.msra.mxu0 %v244_v19 }
  0x2b   :  { %246 = vmatprep.subr.bf16.mxu0 %v291_v0 }
  0x2e   :  { %248 = vmatpush3.bf16.msra.mxu0 %v247_v22 }
  0x2f   :  { %249 = vmatprep.subr.bf16.mxu0 %v291_v0 }
  0x32   :  { %251 = vmatpush3.bf16.msra.mxu0 %v250_v25 }
  0x35   :  { %226 = vmatmul.mubr.f32.vlgmr.msra.gmra.mrb[0].mxu0 %v36_v26 }
 0x108   :  { %v119_v28 = vpop.f32.mrb[0].mxu0 }
 0x109   :  { %v227_v29 = vpop.f32.mrb[1].mxu0  ;;  %v145_v30 = vadd.f32 %v174_v27, %v119_v28 }
 0x10b   :  { %v146_v31 = vmax.f32 %v145_v30, 0.0 }
 0x10d   :  { %148 = vadd.xlane.f32.xlu0 %v146_v31 }
 0x19a   :  { %v149_v34 = vpop.xlane.xlu0 %148 }
 0x19b   :  { %v150_v35 = vadd.f32 %v149_v34, %v147_v33 }
 0x19d   :  { %152 = vst.msk [vmem:[#allocation3] sm:$0xff] %vm34_vm0, %v150_v35 }
 0x1a4   :  { %v155_v36 = vld [vmem:[#allocation3] sm:$0xff] }
 0x1a5   :  { %v156_v37 = vsub.f32 1.0, %v155_v36 }
 0x1a7   :  { %v175_v38 = vmul.f32 -1.442695, %v156_v37 }
 0x1a9   :  { %260 = vpow2.f32 %v175_v38 }
 0x1b3   :  { %v261_v39 = vpop.eup %260 }
 0x1b4   :  { %v160_v40 = vadd.f32 1.0, %v261_v39 }
 0x1b6   :  { %262 = vrcp.f32 %v160_v40 }
 0x1c0   :  { %v263_v41 = vpop.eup %262 }
 0x1c1   :  { %165 = vperm.xlu0 %259, %v263_v41  }
 0x240   :  { %v166_v42 = vpop.permute.xlu0 %165 }
 0x241   :  { %168 = vst [vmem:[%s341_s3] sm:$0xff] %v166_v42 }
 0x242   :  { %173 = vsyncpa [#allocation5], 1 }

</bundles_post_ra>
